<compile_context>
chip_gen: v7x
topology: tpu7x:2x2x1
jax: 0.10.0
libtpu: 0.0.40
codegen_flags: <defaults>
</compile_context>

<pallas_src>
import functools

import jax
import jax.numpy as jnp
from jax.experimental import pallas as pl
from jax.experimental.pallas import tpu as pltpu

_HP = jax.lax.Precision.HIGHEST


# ----------------------------------------------------------------------------
# Fused kernel:
#   table = constraints(MLP_b ++ MLP_e)(spatial) + county_bias     (S, Dt)
#   g     = table^T @ onehot(loc)                                   (Dt, TN)
#   baseline      = clamp(exp(sum coef_b*feat_b + bias_b), max=1e6)
#   effectiveness = clamp(sigmoid(sum coef_e*feat_e + bias_e), 1e-6, 1-1e-6)
#   outcome_mean  = csm * baseline * (1 - alert * effectiveness)
# ----------------------------------------------------------------------------
def _heat_alert_kernel(x_ref, w1_ref, b1_ref, w2_ref, aux_ref, cbias_ref,
                       loc_ref, data_ref, out_ref, *, d_bp, d_ep):
    d_c = d_bp + d_ep

    # --- tiny fused spatial MLPs + constraint transforms --------------------
    # Recomputed on every grid step (8x16@16x64 + 8x64@64x7): negligible and
    # fully hidden under the per-step data DMA; avoids a second pallas_call
    # and an HBM round-trip of the ~200 B coefficient table.
    x = x_ref[...]
    h = jnp.dot(x, w1_ref[...], preferred_element_type=jnp.float32,
                precision=_HP) + b1_ref[...]
    h = h * jax.nn.sigmoid(h)                                     # SiLU
    loc = jnp.dot(h, w2_ref[...], preferred_element_type=jnp.float32,
                  precision=_HP) + aux_ref[0:1, :]                 # + b2
    mode = aux_ref[1:2, :]
    sign = aux_ref[2:3, :]
    coef = jnp.where(mode > 0.0, sign * jnp.exp(loc + 0.5), loc)   # constraints
    # cbias is zero over the coefficient columns and holds the per-county
    # baseline/eff biases in the last two columns; the (constant-1) intercept
    # coefficients sit in those same columns and fold straight into them.
    table = coef + cbias_ref[...]                                  # (S, Dt)

    # --- per-datapoint gather via in-kernel one-hot matmul -------------------
    ids = loc_ref[...]                                             # (1, TN) i32
    data = data_ref[...]                                           # (Dd, TN)
    S = table.shape[0]
    tn = ids.shape[1]
    iota = jax.lax.broadcasted_iota(jnp.int32, (S, tn), 0)
    onehot = (iota == ids).astype(jnp.float32)                     # (S, TN)
    # HIGHEST precision keeps the f32 gather exact (DEFAULT would silently
    # truncate the table to bf16).
    g = jax.lax.dot_general(table, onehot, (((0,), (0,)), ((), ())),
                            preferred_element_type=jnp.float32,
                            precision=_HP)                         # (Dt, TN)

    coef_b, coef_e = g[:d_bp], g[d_bp:d_c]
    bias_b, bias_e = g[d_c:d_c + 1], g[d_c + 1:d_c + 2]
    feat_b, feat_e = data[:d_bp], data[d_bp:d_c]
    csm, alert = data[d_c:d_c + 1], data[d_c + 1:d_c + 2]

    lin_b = jnp.sum(coef_b * feat_b, axis=0, keepdims=True) + bias_b
    baseline = jnp.minimum(jnp.exp(lin_b), 1.0e6)                  # clamp max
    lin_e = jnp.sum(coef_e * feat_e, axis=0, keepdims=True) + bias_e
    eff = jnp.clip(jax.nn.sigmoid(lin_e), 1.0e-6, 1.0 - 1.0e-6)
    outcome = csm * baseline * (1.0 - alert * eff)

    # Direct sublane-slice stores: lane-dense unmasked vst, no concat shuffle.
    out_ref[0:1, :] = eff
    out_ref[1:2, :] = baseline
    out_ref[2:3, :] = outcome


# ----------------------------------------------------------------------------
# Parameter / input packing (producer-side; tiny one-time ops).
# ----------------------------------------------------------------------------
def _linear_params(key, d_in, d_out, scale=0.1):
    kw, kb = jax.random.split(key)
    w = scale * jax.random.normal(kw, (d_in, d_out), jnp.float32)
    b = scale * jax.random.normal(kb, (1, d_out), jnp.float32)
    return w, b


def _constraint_vectors(names, constraints):
    # pyro.sample replaced by the distribution mean:
    #   Normal(loc,1)            -> loc           (mode 0)
    #   LogNormal(loc,1)         -> exp(loc+0.5)  (mode 1, sign +1)
    #   NegativeLogNormal(loc,1) -> -exp(loc+0.5) (mode 1, sign -1)
    mode = [1.0 if constraints.get(n) in ("positive", "negative") else 0.0
            for n in names]
    sign = [-1.0 if constraints.get(n) == "negative" else 1.0 for n in names]
    return (jnp.asarray(mode, jnp.float32)[None, :],
            jnp.asarray(sign, jnp.float32)[None, :])


def make_fused_params(params, baseline_names, baseline_constraints,
                      eff_names, eff_constraints):
    """Fuse both spatial MLPs into one (concatenated L1, block-diagonal L2)
    and permute output columns so the intercept coefficients land last."""
    w1_b, b1_b, w2_b, b2_b = params["baseline"]
    w1_e, b1_e, w2_e, b2_e = params["effectiveness"]
    H = w1_b.shape[1]
    d_b = w2_b.shape[1]
    d_e = w2_e.shape[1]
    b_int = baseline_names.index("intercept")
    e_int = eff_names.index("intercept")

    w1 = jnp.concatenate([w1_b, w1_e], axis=1)                    # (Din, 2H)
    b1 = jnp.concatenate([b1_b, b1_e], axis=1)                    # (1, 2H)
    w2 = jnp.zeros((2 * H, d_b + d_e), jnp.float32)
    w2 = w2.at[:H, :d_b].set(w2_b).at[H:, d_b:].set(w2_e)         # block-diag
    b2 = jnp.concatenate([b2_b, b2_e], axis=1)

    mode_b, sign_b = _constraint_vectors(baseline_names, baseline_constraints)
    mode_e, sign_e = _constraint_vectors(eff_names, eff_constraints)
    mode = jnp.concatenate([mode_b, mode_e], axis=1)
    sign = jnp.concatenate([sign_b, sign_e], axis=1)

    # Intercept coefficients go in the last two columns so they can be folded
    # into the per-county bias rows (keeps table & data slab <= 8 sublanes).
    b_idx = [i for i in range(d_b) if i != b_int]
    e_idx = [d_b + i for i in range(d_e) if i != e_int]
    perm = b_idx + e_idx + [b_int, d_b + e_int]
    w2, b2 = w2[:, perm], b2[:, perm]
    mode, sign = mode[:, perm], sign[:, perm]

    aux = jnp.concatenate([b2, mode, sign], axis=0)               # (3, Dc)
    return {"w1": w1, "b1": b1, "w2": w2, "aux": aux,
            "d_bp": d_b - 1, "d_ep": d_e - 1,
            "b_int_idx": b_int, "e_int_idx": e_int}


def pack_data(bfeat, efeat, csm, alert, loc_ind, b_int_idx, e_int_idx):
    """Producer-side packing: drop the constant-1 intercept feature columns
    (their coefficients are folded into the county bias rows) and pack all
    per-datapoint inputs into one lane-dense (D<=8, N) slab.  loc_ind values
    must lie in [0, S) (out-of-range indices silently give a zero gather)."""
    d_b, d_e = bfeat.shape[1], efeat.shape[1]
    b_cols = [i for i in range(d_b) if i != b_int_idx]
    e_cols = [i for i in range(d_e) if i != e_int_idx]
    data_T = jnp.concatenate(
        [bfeat[:, b_cols].T, efeat[:, e_cols].T, csm[None, :], alert[None, :]],
        axis=0).astype(jnp.float32)                                # (Dd, N)
    loc_T = loc_ind.astype(jnp.int32)[None, :]                     # (1, N)
    return data_T, loc_T


def _pick_tile_n(N, num_cores):
    """Largest lane-dense tile (cap 2048): one tile on single-TC chips,
    >=2 tiles only when num_cores > 1 (v7x megacore)."""
    n_blocks = pl.cdiv(max(N, 1), 128)
    per_core = pl.cdiv(n_blocks, max(num_cores, 1))
    return min(16, per_core) * 128


# ----------------------------------------------------------------------------
# Forward wrapper: one pallas_call.
# ----------------------------------------------------------------------------
def heat_alert_forward(spatial_features, loc_T, data_T, county_bias, fused,
                       *, tile_n=None, num_cores=1):
    """Fused HeatAlert forward.

    spatial_features: (S, Din)   per-county spatial covariates.
    loc_T:            (1, N) int32 county index per datapoint.
    data_T:           (d_bp+d_ep+2, N) packed slab from pack_data().
    county_bias:      (S, 2) columns [baseline_bias | eff_bias].
    Returns the lane-dense (3, N) slab [effectiveness, baseline, outcome_mean].
    Pass num_cores=2 on v7x so both TensorCores get a grid step.
    """
    S = spatial_features.shape[0]
    d_bp, d_ep = fused["d_bp"], fused["d_ep"]
    d_c = d_bp + d_ep
    D_total = d_c + 2
    D_data, N = data_T.shape
    assert D_data == D_total

    # Per-county biases laid out in table coordinates (zeros over coef cols).
    cbias = jnp.zeros((S, D_total), jnp.float32)
    cbias = cbias.at[:, d_c].set(county_bias[:, 0])
    cbias = cbias.at[:, d_c + 1].set(county_bias[:, 1])

    if tile_n is None:
        tile_n = _pick_tile_n(N, num_cores)
    n_pad = pl.cdiv(N, tile_n) * tile_n
    if n_pad != N:   # ragged tail: padded lanes are computed, clamped, dropped
        data_T = jnp.pad(data_T, ((0, 0), (0, n_pad - N)))
        loc_T = jnp.pad(loc_T, ((0, 0), (0, n_pad - N)))

    full = lambda a: pl.BlockSpec(a.shape, lambda i: (0, 0))
    out = pl.pallas_call(
        functools.partial(_heat_alert_kernel, d_bp=d_bp, d_ep=d_ep),
        out_shape=jax.ShapeDtypeStruct((3, n_pad), jnp.float32),
        grid=(n_pad // tile_n,),
        in_specs=[
            full(spatial_features), full(fused["w1"]), full(fused["b1"]),
            full(fused["w2"]), full(fused["aux"]), full(cbias),
            pl.BlockSpec((1, tile_n), lambda i: (0, i)),       # county ids
            pl.BlockSpec((D_data, tile_n), lambda i: (0, i)),  # packed data
        ],
        out_specs=pl.BlockSpec((3, tile_n), lambda i: (0, i)), # lane-dense out
        compiler_params=pltpu.CompilerParams(
            dimension_semantics=("parallel",),
            vmem_limit_bytes=32 * 1024 * 1024),  # well within v5e/v6e/v7x
    )(spatial_features, fused["w1"], fused["b1"], fused["w2"],
      fused["aux"], cbias, loc_T, data_T)
    return out if n_pad == N else out[:, :N]


# ----------------------------------------------------------------------------
# Pure-JAX reference (direct indexing, un-fused) for correctness.
# ----------------------------------------------------------------------------
def _apply_constraints(loc, names, constraints):
    cols = []
    for i, name in enumerate(names):
        col = loc[:, i]
        c = constraints.get(name, None)
        if c == "positive":
            col = jnp.exp(col + 0.5)
        elif c == "negative":
            col = -jnp.exp(col + 0.5)
        cols.append(col)
    return jnp.stack(cols, axis=1)


def _reference(spatial_features, loc_ind, csm, alert, bfeat, efeat, params,
               b_names, b_cons, e_names, e_cons, baseline_bias, eff_bias):
    def mlp(x, w1, b1, w2, b2):
        h = jnp.dot(x, w1, precision=_HP) + b1
        h = h * jax.nn.sigmoid(h)
        return jnp.dot(h, w2, precision=_HP) + b2

    baseline_loc = mlp(spatial_features, *params["baseline"])
    eff_loc = mlp(spatial_features, *params["effectiveness"])
    coef_b = _apply_constraints(baseline_loc, b_names, b_cons)
    coef_e = _apply_constraints(eff_loc, e_names, e_cons)

    lin_b = jnp.sum(coef_b[loc_ind] * bfeat, axis=1) + baseline_bias[loc_ind]
    baseline = jnp.minimum(jnp.exp(lin_b), 1.0e6)
    lin_e = jnp.sum(coef_e[loc_ind] * efeat, axis=1) + eff_bias[loc_ind]
    eff = jnp.clip(jax.nn.sigmoid(lin_e), 1.0e-6, 1.0 - 1.0e-6)
    outcome = csm * baseline * (1.0 - alert * eff)
    return jnp.stack([eff, baseline, outcome], axis=1)


if __name__ == "__main__":
    # Small synthetic shapes consistent with the module.
    S = 8              # number of counties (spatial rows)
    D_SPATIAL = 16     # spatial feature dim
    HIDDEN = 32        # MLP hidden dim
    N = 256            # number of data points
    baseline_names = ["heat_qi", "excess_heat", "alert_lag1", "intercept"]
    baseline_constraints = {"heat_qi": "positive", "alert_lag1": "negative"}
    eff_names = ["heat_qi", "excess_heat", "intercept"]
    eff_constraints = {"excess_heat": "positive"}
    D_B = len(baseline_names)
    D_E = len(eff_names)

    key = jax.random.PRNGKey(0)
    keys = jax.random.split(key, 12)

    spatial_features = jax.random.normal(keys[0], (S, D_SPATIAL), jnp.float32)

    params = {
        "baseline": (*_linear_params(keys[1], D_SPATIAL, HIDDEN),
                     *_linear_params(keys[2], HIDDEN, D_B)),
        "effectiveness": (*_linear_params(keys[3], D_SPATIAL, HIDDEN),
                          *_linear_params(keys[4], HIDDEN, D_E)),
    }

    loc_ind = jax.random.randint(keys[5], (N,), 0, S)
    county_summer_mean = jax.random.uniform(keys[6], (N,), jnp.float32, 0.5, 5.0)
    alert = jax.random.bernoulli(keys[7], 0.3, (N,)).astype(jnp.float32)
    baseline_features = 0.5 * jax.random.normal(keys[8], (N, D_B), jnp.float32)
    baseline_features = baseline_features.at[
        :, baseline_names.index("intercept")].set(1.0)   # intercept col = 1
    eff_features = 0.5 * jax.random.normal(keys[9], (N, D_E), jnp.float32)
    eff_features = eff_features.at[:, eff_names.index("intercept")].set(1.0)

    # TODO(synk): pyro.sample of per-county biases / coefficients and the
    # Poisson observation plate have no Pallas equivalent; deterministic
    # means / fixed uniform draws are used instead.
    baseline_bias = jax.random.uniform(keys[10], (S,), jnp.float32, -0.5, 0.5)
    eff_bias = jax.random.uniform(keys[11], (S,), jnp.float32, -10.0, 2.0)
    county_bias = jnp.stack([baseline_bias, eff_bias], axis=1)     # (S, 2)

    fused = make_fused_params(params, baseline_names, baseline_constraints,
                              eff_names, eff_constraints)
    data_T, loc_T = pack_data(baseline_features, eff_features,
                              county_summer_mean, alert, loc_ind,
                              fused["b_int_idx"], fused["e_int_idx"])

    out_T = heat_alert_forward(spatial_features, loc_T, data_T,
                               county_bias, fused)
    out_T = jax.block_until_ready(out_T)

    ref = _reference(spatial_features, loc_ind, county_summer_mean, alert,
                     baseline_features, eff_features, params,
                     baseline_names, baseline_constraints,
                     eff_names, eff_constraints, baseline_bias, eff_bias)

    assert out_T.shape == (3, N)
    assert jnp.allclose(out_T.T, ref, rtol=1e-5, atol=1e-5), \
        "mismatch vs reference"

    print("KERNEL_OK")
</pallas_src>

<mosaic_0001>
module attributes {stable_mosaic.version = 11 : i64} {
  func.func @_heat_alert_kernel(%arg0: i32, %arg1: memref<8x16xf32, #tpu.memory_space<vmem>>, %arg2: memref<16x64xf32, #tpu.memory_space<vmem>>, %arg3: memref<1x64xf32, #tpu.memory_space<vmem>>, %arg4: memref<64x7xf32, #tpu.memory_space<vmem>>, %arg5: memref<3x7xf32, #tpu.memory_space<vmem>>, %arg6: memref<8x7xf32, #tpu.memory_space<vmem>>, %arg7: memref<1x256xi32, #tpu.memory_space<vmem>>, %arg8: memref<7x256xf32, #tpu.memory_space<vmem>>, %arg9: memref<3x256xf32, #tpu.memory_space<vmem>>) attributes {dimension_semantics = [#tpu.dimension_semantics<parallel>], iteration_bounds = array<i64: 1>, scalar_prefetch = 0 : i64, scratch_operands = 0 : i64, tpu.core_type = #tpu.core_type<tc>, window_params = [{pipeline_mode = #tpu.pipeline_mode<synchronous>, transform_indices = @transform_0, window_bounds = array<i64: 8, 16>}, {pipeline_mode = #tpu.pipeline_mode<synchronous>, transform_indices = @transform_1, window_bounds = array<i64: 16, 64>}, {pipeline_mode = #tpu.pipeline_mode<synchronous>, transform_indices = @transform_2, window_bounds = array<i64: 1, 64>}, {pipeline_mode = #tpu.pipeline_mode<synchronous>, transform_indices = @transform_3, window_bounds = array<i64: 64, 7>}, {pipeline_mode = #tpu.pipeline_mode<synchronous>, transform_indices = @transform_4, window_bounds = array<i64: 3, 7>}, {pipeline_mode = #tpu.pipeline_mode<synchronous>, transform_indices = @transform_5, window_bounds = array<i64: 8, 7>}, {transform_indices = @transform_6, window_bounds = array<i64: 1, 256>}, {transform_indices = @transform_7, window_bounds = array<i64: 7, 256>}, {transform_indices = @transform_8, window_bounds = array<i64: 3, 256>}]} {
    %c0 = arith.constant 0 : index
    %c0_0 = arith.constant 0 : index
    %0 = vector.load %arg1[%c0, %c0_0] : memref<8x16xf32, #tpu.memory_space<vmem>>, vector<8x16xf32>
    %c0_1 = arith.constant 0 : index
    %c0_2 = arith.constant 0 : index
    %1 = vector.load %arg2[%c0_1, %c0_2] : memref<16x64xf32, #tpu.memory_space<vmem>>, vector<16x64xf32>
    %cst = arith.constant dense<0.000000e+00> : vector<8x64xf32>
    %2 = tpu.matmul %0, %1, %cst {dimension_numbers = #tpu.dot_dimension_numbers<[1], [0], [0], [1], [0, 0, 1, 1], [], []>, precision = #tpu.contract_precision<fp32>} : vector<8x16xf32>, vector<16x64xf32>, vector<8x64xf32> -> vector<8x64xf32>
    %c0_3 = arith.constant 0 : index
    %c0_4 = arith.constant 0 : index
    %3 = vector.load %arg3[%c0_3, %c0_4] : memref<1x64xf32, #tpu.memory_space<vmem>>, vector<1x64xf32>
    %4 = vector.broadcast %3 : vector<1x64xf32> to vector<8x64xf32>
    %5 = arith.addf %2, %4 : vector<8x64xf32>
    %6 = arith.negf %5 : vector<8x64xf32>
    %7 = math.exp %6 : vector<8x64xf32>
    %cst_5 = arith.constant 1.000000e+00 : f32
    %8 = vector.broadcast %cst_5 : f32 to vector<8x64xf32>
    %9 = arith.addf %8, %7 : vector<8x64xf32>
    %10 = arith.divf %8, %9 : vector<8x64xf32>
    %11 = arith.mulf %5, %10 : vector<8x64xf32>
    %c0_6 = arith.constant 0 : index
    %c0_7 = arith.constant 0 : index
    %12 = vector.load %arg4[%c0_6, %c0_7] : memref<64x7xf32, #tpu.memory_space<vmem>>, vector<64x7xf32>
    %cst_8 = arith.constant dense<0.000000e+00> : vector<8x7xf32>
    %13 = tpu.matmul %11, %12, %cst_8 {dimension_numbers = #tpu.dot_dimension_numbers<[1], [0], [0], [1], [0, 0, 1, 1], [], []>, precision = #tpu.contract_precision<fp32>} : vector<8x64xf32>, vector<64x7xf32>, vector<8x7xf32> -> vector<8x7xf32>
    %c0_9 = arith.constant 0 : index
    %c0_10 = arith.constant 0 : index
    %14 = vector.load %arg5[%c0_9, %c0_10] : memref<3x7xf32, #tpu.memory_space<vmem>>, vector<1x7xf32>
    %15 = vector.broadcast %14 : vector<1x7xf32> to vector<8x7xf32>
    %16 = arith.addf %13, %15 : vector<8x7xf32>
    %c1 = arith.constant 1 : index
    %c0_11 = arith.constant 0 : index
    %17 = vector.load %arg5[%c1, %c0_11] : memref<3x7xf32, #tpu.memory_space<vmem>>, vector<1x7xf32>
    %c2 = arith.constant 2 : index
    %c0_12 = arith.constant 0 : index
    %18 = vector.load %arg5[%c2, %c0_12] : memref<3x7xf32, #tpu.memory_space<vmem>>, vector<1x7xf32>
    %cst_13 = arith.constant 0.000000e+00 : f32
    %19 = vector.broadcast %cst_13 : f32 to vector<1x7xf32>
    %20 = arith.cmpf ogt, %17, %19 : vector<1x7xf32>
    %cst_14 = arith.constant 5.000000e-01 : f32
    %21 = vector.broadcast %cst_14 : f32 to vector<8x7xf32>
    %22 = arith.addf %16, %21 : vector<8x7xf32>
    %23 = math.exp %22 : vector<8x7xf32>
    %24 = vector.broadcast %18 : vector<1x7xf32> to vector<8x7xf32>
    %25 = arith.mulf %24, %23 : vector<8x7xf32>
    %26 = vector.shape_cast %20 : vector<1x7xi1> to vector<1x7xi1>
    %27 = vector.broadcast %26 : vector<1x7xi1> to vector<8x7xi1>
    %28 = arith.select %27, %25, %16 : vector<8x7xi1>, vector<8x7xf32>
    %c0_15 = arith.constant 0 : index
    %c0_16 = arith.constant 0 : index
    %29 = vector.load %arg6[%c0_15, %c0_16] : memref<8x7xf32, #tpu.memory_space<vmem>>, vector<8x7xf32>
    %30 = arith.addf %28, %29 : vector<8x7xf32>
    %c0_17 = arith.constant 0 : index
    %c0_18 = arith.constant 0 : index
    %31 = vector.load %arg7[%c0_17, %c0_18] : memref<1x256xi32, #tpu.memory_space<vmem>>, vector<1x256xi32>
    %c0_19 = arith.constant 0 : index
    %c0_20 = arith.constant 0 : index
    %32 = vector.load %arg8[%c0_19, %c0_20] : memref<7x256xf32, #tpu.memory_space<vmem>>, vector<7x256xf32>
    %33 = tpu.iota {dimensions = array<i32: 0>} : vector<8x256xi32>
    %34 = vector.broadcast %31 : vector<1x256xi32> to vector<8x256xi32>
    %35 = arith.cmpi eq, %33, %34 : vector<8x256xi32>
    %36 = arith.extui %35 : vector<8x256xi1> to vector<8x256xi32>
    %37 = arith.sitofp %36 : vector<8x256xi32> to vector<8x256xf32>
    %cst_21 = arith.constant dense<0.000000e+00> : vector<7x256xf32>
    %38 = tpu.matmul %30, %37, %cst_21 {dimension_numbers = #tpu.dot_dimension_numbers<[0], [0], [1], [1], [0, 1, 1, 1], [], []>, precision = #tpu.contract_precision<fp32>} : vector<8x7xf32>, vector<8x256xf32>, vector<7x256xf32> -> vector<7x256xf32>
    %39 = vector.extract_strided_slice %38 {offsets = [0, 0], sizes = [3, 256], strides = [1, 1]} : vector<7x256xf32> to vector<3x256xf32>
    %40 = vector.extract_strided_slice %38 {offsets = [3, 0], sizes = [2, 256], strides = [1, 1]} : vector<7x256xf32> to vector<2x256xf32>
    %41 = vector.extract_strided_slice %38 {offsets = [5, 0], sizes = [1, 256], strides = [1, 1]} : vector<7x256xf32> to vector<1x256xf32>
    %42 = vector.extract_strided_slice %38 {offsets = [6, 0], sizes = [1, 256], strides = [1, 1]} : vector<7x256xf32> to vector<1x256xf32>
    %43 = vector.extract_strided_slice %32 {offsets = [0, 0], sizes = [3, 256], strides = [1, 1]} : vector<7x256xf32> to vector<3x256xf32>
    %44 = vector.extract_strided_slice %32 {offsets = [3, 0], sizes = [2, 256], strides = [1, 1]} : vector<7x256xf32> to vector<2x256xf32>
    %45 = vector.extract_strided_slice %32 {offsets = [5, 0], sizes = [1, 256], strides = [1, 1]} : vector<7x256xf32> to vector<1x256xf32>
    %46 = vector.extract_strided_slice %32 {offsets = [6, 0], sizes = [1, 256], strides = [1, 1]} : vector<7x256xf32> to vector<1x256xf32>
    %47 = arith.mulf %39, %43 : vector<3x256xf32>
    %cst_22 = arith.constant dense<0.000000e+00> : vector<256xf32>
    %48 = vector.multi_reduction <add>, %47, %cst_22 [0] : vector<3x256xf32> to vector<256xf32>
    %49 = vector.shape_cast %48 : vector<256xf32> to vector<1x256xf32>
    %50 = arith.addf %49, %41 : vector<1x256xf32>
    %51 = math.exp %50 : vector<1x256xf32>
    %cst_23 = arith.constant 1.000000e+06 : f32
    %52 = vector.broadcast %cst_23 : f32 to vector<1x256xf32>
    %53 = arith.minimumf %51, %52 : vector<1x256xf32>
    %54 = arith.mulf %40, %44 : vector<2x256xf32>
    %cst_24 = arith.constant dense<0.000000e+00> : vector<256xf32>
    %55 = vector.multi_reduction <add>, %54, %cst_24 [0] : vector<2x256xf32> to vector<256xf32>
    %56 = vector.shape_cast %55 : vector<256xf32> to vector<1x256xf32>
    %57 = arith.addf %56, %42 : vector<1x256xf32>
    %58 = arith.negf %57 : vector<1x256xf32>
    %59 = math.exp %58 : vector<1x256xf32>
    %cst_25 = arith.constant 1.000000e+00 : f32
    %60 = vector.broadcast %cst_25 : f32 to vector<1x256xf32>
    %61 = arith.addf %60, %59 : vector<1x256xf32>
    %62 = arith.divf %60, %61 : vector<1x256xf32>
    %cst_26 = arith.constant 9.99999997E-7 : f32
    %cst_27 = arith.constant 0.999998986 : f32
    %63 = vector.broadcast %cst_26 : f32 to vector<1x256xf32>
    %64 = arith.maximumf %63, %62 : vector<1x256xf32>
    %65 = vector.broadcast %cst_27 : f32 to vector<1x256xf32>
    %66 = arith.minimumf %65, %64 : vector<1x256xf32>
    %67 = arith.mulf %45, %53 : vector<1x256xf32>
    %68 = arith.mulf %46, %66 : vector<1x256xf32>
    %cst_28 = arith.constant 1.000000e+00 : f32
    %69 = vector.broadcast %cst_28 : f32 to vector<1x256xf32>
    %70 = arith.subf %69, %68 : vector<1x256xf32>
    %71 = arith.mulf %67, %70 : vector<1x256xf32>
    %c0_29 = arith.constant 0 : index
    %c0_30 = arith.constant 0 : index
    %72 = vector.load %arg9[%c0_29, %c0_30] : memref<3x256xf32, #tpu.memory_space<vmem>>, vector<1x256xf32>
    tpu.vector_store %arg9[%c0_29, %c0_30], %66 {strides = array<i32>} : memref<3x256xf32, #tpu.memory_space<vmem>>, vector<1x256xf32>,
    %c1_31 = arith.constant 1 : index
    %c0_32 = arith.constant 0 : index
    %73 = vector.load %arg9[%c1_31, %c0_32] : memref<3x256xf32, #tpu.memory_space<vmem>>, vector<1x256xf32>
    tpu.vector_store %arg9[%c1_31, %c0_32], %53 {strides = array<i32>} : memref<3x256xf32, #tpu.memory_space<vmem>>, vector<1x256xf32>,
    %c2_33 = arith.constant 2 : index
    %c0_34 = arith.constant 0 : index
    %74 = vector.load %arg9[%c2_33, %c0_34] : memref<3x256xf32, #tpu.memory_space<vmem>>, vector<1x256xf32>
    tpu.vector_store %arg9[%c2_33, %c0_34], %71 {strides = array<i32>} : memref<3x256xf32, #tpu.memory_space<vmem>>, vector<1x256xf32>,
    return
  }
  func.func @transform_0(%arg0: i32) -> (i32, i32) {
    %c0_i32 = arith.constant 0 : i32
    %c0_i32_0 = arith.constant 0 : i32
    %c0_i32_1 = arith.constant 0 : i32
    return %c0_i32, %c0_i32_0 : i32, i32
  }
  func.func @transform_1(%arg0: i32) -> (i32, i32) {
    %c0_i32 = arith.constant 0 : i32
    %c0_i32_0 = arith.constant 0 : i32
    %c0_i32_1 = arith.constant 0 : i32
    return %c0_i32, %c0_i32_0 : i32, i32
  }
  func.func @transform_2(%arg0: i32) -> (i32, i32) {
    %c0_i32 = arith.constant 0 : i32
    %c0_i32_0 = arith.constant 0 : i32
    %c0_i32_1 = arith.constant 0 : i32
    return %c0_i32, %c0_i32_0 : i32, i32
  }
  func.func @transform_3(%arg0: i32) -> (i32, i32) {
    %c0_i32 = arith.constant 0 : i32
    %c0_i32_0 = arith.constant 0 : i32
    %c0_i32_1 = arith.constant 0 : i32
    return %c0_i32, %c0_i32_0 : i32, i32
  }
  func.func @transform_4(%arg0: i32) -> (i32, i32) {
    %c0_i32 = arith.constant 0 : i32
    %c0_i32_0 = arith.constant 0 : i32
    %c0_i32_1 = arith.constant 0 : i32
    return %c0_i32, %c0_i32_0 : i32, i32
  }
  func.func @transform_5(%arg0: i32) -> (i32, i32) {
    %c0_i32 = arith.constant 0 : i32
    %c0_i32_0 = arith.constant 0 : i32
    %c0_i32_1 = arith.constant 0 : i32
    return %c0_i32, %c0_i32_0 : i32, i32
  }
  func.func @transform_6(%arg0: i32) -> (i32, i32) {
    %c0_i32 = arith.constant 0 : i32
    %c0_i32_0 = arith.constant 0 : i32
    return %c0_i32, %arg0 : i32, i32
  }
  func.func @transform_7(%arg0: i32) -> (i32, i32) {
    %c0_i32 = arith.constant 0 : i32
    %c0_i32_0 = arith.constant 0 : i32
    return %c0_i32, %arg0 : i32, i32
  }
  func.func @transform_8(%arg0: i32) -> (i32, i32) {
    %c0_i32 = arith.constant 0 : i32
    %c0_i32_0 = arith.constant 0 : i32
    return %c0_i32, %arg0 : i32, i32
  }
}

</mosaic_0001>

<bundles_post_ra>
// kernel: tpu_custom_call.1
= control target key start
LH: loop header
LB: loop body
LE: loop exit
PB: predicated region body
PF: predicated region fallthrough
CT: control target
= control target key end

     0   :  { %v2174_v3 = vmov 0.0|0.0   ;;  %vm2175_vm0 = vmmov 0   ;;  %v2176_v6 = vmov 0.0   ;;  %vm40_vm1 = vcmask 130048   ;;  %s2470_s0 = inlined_call_operand.vmem [shape: f32[8,16], index: 0, kind: input, shape index: {}]   ;;  %s2471_s1 = inlined_call_operand.vmem [shape: f32[16,64], index: 1, kind: input, shape index: {}]   ;;  %s2472_s2 = inlined_call_operand.vmem [shape: f32[1,64], index: 2, kind: input, shape index: {}]   ;;  %s2473_s3 = inlined_call_operand.vmem [shape: f32[64,7], index: 3, kind: input, shape index: {}]   ;;  %s2474_s4 = inlined_call_operand.vmem [shape: f32[3,7], index: 4, kind: input, shape index: {}]   ;;  %s2475_s5 = inlined_call_operand.vmem [shape: f32[8,7], index: 5, kind: input, shape index: {}]   ;;  %s2476_s6 = inlined_call_operand.vmem [shape: s32[1,256], index: 6, kind: input, shape index: {}]   ;;  %s2477_s7 = inlined_call_operand.vmem [shape: f32[7,256], index: 7, kind: input, shape index: {}]   ;;  %s2478_s8 = inlined_call_operand.hbm [shape: f32[3,256], index: 8, kind: output, shape index: {}]  }
   0x1   :  { %v31_v0 = vld [vmem:[%s2471_s1] sm:$0xff]  ;;  %v32_v1 = vld [vmem:[%s2471_s1 + $0x8] sm:$0xff]  ;;  %2004 = vmatprep.subr.bf16.mxu0 %v2174_v3  ;;  %1852 = vmatprep.mubr.msk.f32.mxu0 %vm2175_vm0, %v2176_v6 }
   0x2   :  { %v30_v2 = vld [vmem:[%s2470_s0] sm:$0xff]  ;;  %v45_v4 = vand.u32 4294901760, %v31_v0  ;;  %v48_v5 = vand.u32 4294901760, %v32_v1  ;;  %2034 = vmatprep.subr.bf16.mxu1 %v2174_v3  ;;  %1925 = vmatprep.mubr.msk.f32.mxu1 %vm2175_vm0, %v2176_v6 }
   0x3   :  { %v42_v7 = vsel %vm40_vm1, %v30_v2, 0 }
   0x4   :  { %13 = vsyncpa [#allocation3], 0  ;;  %v2005_v8 = vpack.c.bf16 %v48_v5, %v45_v4  ;;  %v123_v9 = vsub.f32 %v31_v0, %v45_v4  ;;  %v130_v10 = vsub.f32 %v32_v1, %v48_v5  ;;  %v111_v11 = vand.u32 4294901760, %v42_v7  ;;  %v510_v25 = vld [vmem:[%s2473_s3] sm:$0xff]  ;;  %v511_v26 = vld [vmem:[%s2473_s3 + $0x8] sm:$0xff] }
   0x5   :  { %v528_v27 = vand.u32 4294901760, %v510_v25  ;;  %v531_v28 = vand.u32 4294901760, %v511_v26  ;;  %v512_v31 = vld [vmem:[%s2473_s3 + $0x10] sm:$0xff]  ;;  %v513_v32 = vld [vmem:[%s2473_s3 + $0x18] sm:$0xff]  ;;  %v514_v41 = vld [vmem:[%s2473_s3 + $0x20] sm:$0xff]  ;;  %vm523_vm2 = vcmask 523264  }
   0x6   :  { %2006 = vmatpush3.bf16.msra.mxu0 %v2005_v8  ;;  %v112_v12 = vsub.f32 %v42_v7, %v111_v11  ;;  %v124_v13 = vand.u32 4294901760, %v123_v9  ;;  %v131_v14 = vand.u32 4294901760, %v130_v10  ;;  %v2011_v23 = vpack.c.bf16 %v130_v10, %v123_v9  ;;  %v515_v42 = vld [vmem:[%s2473_s3 + $0x28] sm:$0xff]  ;;  %v516_v54 = vld [vmem:[%s2473_s3 + $0x30] sm:$0xff]  ;;  %v517_v55 = vld [vmem:[%s2473_s3 + $0x38] sm:$0xff] }
   0x7   :  { %2007 = vmatprep.subr.bf16.mxu0 %v2174_v3  ;;  %v2265_v29 = vsub.f32 %v510_v25, %v528_v27  ;;  %v2267_v30 = vsub.f32 %v511_v26, %v531_v28  ;;  %v534_v35 = vand.u32 4294901760, %v512_v31  ;;  %v537_v36 = vand.u32 4294901760, %v513_v32 }
   0x8   :  { %v113_v15 = vand.u32 4294901760, %v112_v12  ;;  %v125_v16 = vsub.f32 %v123_v9, %v124_v13  ;;  %v132_v17 = vsub.f32 %v130_v10, %v131_v14  ;;  %v2017_v24 = vpack.c.bf16 %v131_v14, %v124_v13 }
   0x9   :  { %v613_v33 = vand.u32 4294901760, %v2265_v29  ;;  %v620_v34 = vand.u32 4294901760, %v2267_v30  ;;  %v2283_v39 = vsub.f32 %v512_v31, %v534_v35  ;;  %v2285_v40 = vsub.f32 %v513_v32, %v537_v36 }
   0xa   :  { %v114_v18 = vsub.f32 %v112_v12, %v113_v15  ;;  %v126_v19 = vand.u32 4294901760, %v125_v16  ;;  %v133_v20 = vand.u32 4294901760, %v132_v17  ;;  %v540_v47 = vand.u32 4294901760, %v514_v41 }
   0xb   :  { %v614_v37 = vsub.f32 %v2265_v29, %v613_v33  ;;  %v621_v38 = vsub.f32 %v2267_v30, %v620_v34  ;;  %v627_v45 = vand.u32 4294901760, %v2283_v39  ;;  %v634_v46 = vand.u32 4294901760, %v2285_v40 }
   0xc   :  { %v115_v21 = vand.u32 4294901760, %v114_v18  ;;  %v2008_v22 = vpack.c.bf16 %v133_v20, %v126_v19  ;;  %v543_v48 = vand.u32 4294901760, %v515_v42  ;;  %v2297_v52 = vsub.f32 %v514_v41, %v540_v47 }
   0xd   :  { %v615_v43 = vand.u32 4294901760, %v614_v37  ;;  %v622_v44 = vand.u32 4294901760, %v621_v38  ;;  %v628_v50 = vsub.f32 %v2283_v39, %v627_v45  ;;  %v635_v51 = vsub.f32 %v2285_v40, %v634_v46 }
   0xe   :  { %1853 = vmatmul.mubr.f32.vlgmr.msra.gmra.mrb[0].mxu0 %v115_v21  ;;  %v2299_v53 = vsub.f32 %v515_v42, %v543_v48  ;;  %v546_v58 = vand.u32 4294901760, %v516_v54  ;;  %v549_v59 = vand.u32 4294901760, %v517_v55  ;;  %v641_v60 = vand.u32 4294901760, %v2297_v52 }
   0xf   :  { %2009 = vmatpush3.bf16.msra.mxu0 %v2008_v22  ;;  %1859 = vmatprep.mubr.msk.f32.mxu0 %vm2175_vm0, %v2176_v6  ;;  %v2035_v49 = vpack.c.bf16 %v622_v44, %v615_v43  ;;  %v629_v56 = vand.u32 4294901760, %v628_v50  ;;  %v636_v57 = vand.u32 4294901760, %v635_v51  ;;  %v2326_v16 = vpack.c.bf16 %v537_v36, %v534_v35  ;;  %v1764_v44 = vld [vmem:[%s2474_s4] ss:$0 sm:$0xff]  ;;  %v1064_v51 = vld [vmem:[%s2474_s4 + $0x1] sm:$0x1] }
  0x10   :  { %2010 = vmatprep.subr.bf16.mxu0 %v2174_v3  ;;  %v648_v61 = vand.u32 4294901760, %v2299_v53  ;;  %v2310_v63 = vsub.f32 %v516_v54, %v546_v58  ;;  %v2312_v0 = vsub.f32 %v517_v55, %v549_v59  ;;  %v642_v1 = vsub.f32 %v2297_v52, %v641_v60 }
  0x11   :  { %2036 = vmatpush3.bf16.msra.mxu1 %v2035_v49  ;;  %v2038_v62 = vpack.c.bf16 %v636_v57, %v629_v56  ;;  %v2047_v17 = vpack.c.bf16 %v2267_v30, %v2265_v29  ;;  %v2333_v18 = vpack.c.bf16 %v543_v48, %v540_v47  ;;  %v2050_v19 = vpack.c.bf16 %v2285_v40, %v2283_v39  ;;  %v1765_v57 = vld [vmem:[%s2474_s4 + $0x2] ss:$0 sm:$0xff] }
  0x12   :  { %2037 = vmatprep.subr.bf16.mxu1 %v2174_v3  ;;  %v649_v2 = vsub.f32 %v2299_v53, %v648_v61  ;;  %v655_v4 = vand.u32 4294901760, %v2310_v63  ;;  %v662_v5 = vand.u32 4294901760, %v2312_v0  ;;  %v643_v7 = vand.u32 4294901760, %v642_v1 }
  0x13   :  { %v2339_v20 = vpack.c.bf16 %v549_v59, %v546_v58  ;;  %v2053_v21 = vpack.c.bf16 %v2299_v53, %v2297_v52  ;;  %v2056_v22 = vpack.c.bf16 %v2312_v0, %v2310_v63  ;;  %v2077_v25 = vpack.c.bf16 %v648_v61, %v641_v60  ;;  %v1082_v60 = vld [vmem:[%s2475_s5] sm:$0xff] }
  0x14   :  { %v656_v9 = vsub.f32 %v2310_v63, %v655_v4  ;;  %v663_v10 = vsub.f32 %v2312_v0, %v662_v5  ;;  %v2080_v26 = vpack.c.bf16 %v662_v5, %v655_v4  ;;  %v1076_v49 = vlaneseq  ;;  %v1084_v0 = vld [vmem:[%s2476_s6] sm:$0x3] }
  0x15   :  { %2039 = vmatpush3.bf16.msra.mxu1 %v2038_v62  ;;  %vm1066_vm3 = vcmp.gt.f32.partialorder %v1064_v51, 0.0  ;;  %v2177_v54 = vmov 0   ;;  %v2178_v5 = vmov 1.0   ;;  %vm1135_vm7 = vcmask 64512  }
  0x16   :  { %1860 = vmatmul.mubr.f32.vlgmr.msra.gmra.mrb[0].mxu0 %v111_v11  ;;  %2040 = vmatprep.subr.bf16.mxu1 %v2174_v3  ;;  %v657_v13 = vand.u32 4294901760, %v656_v9  ;;  %v664_v14 = vand.u32 4294901760, %v663_v10  ;;  %v2392_v52 = vshrl.u32 %v1076_v49, 7  ;;  %v1075_v55 = vsel %vm1066_vm3, 1, %v2177_v54 }
  0x17   :  { %2012 = vmatpush3.bf16.msra.mxu0 %v2011_v23  ;;  %1866 = vmatprep.mubr.msk.f32.mxu0 %vm2175_vm0, %v2176_v6  ;;  %v2071_v23 = vpack.c.bf16 %v620_v34, %v613_v33  ;;  %vm1606_vm8 = vcmask 1042432   ;;  %vm1635_vm9 = vcmask 1041408   ;;  %vm2444_vm10 = vcmp.lt.s32.totalorder %v1076_v49, 256 }
  0x18   :  { %2013 = vmatprep.subr.bf16.mxu0 %v2174_v3  ;;  %v1078_v53 = vsub.s32 0, %v2392_v52  ;;  %v1095_v63 = vsub.s32 1, %v2392_v52 }
  0x1a   :  { %v1079_v56 = vrot.slane %v1075_v55, %v1078_v53  ;;  %v1096_v1 = vrot.slane %v1084_v0, %v1095_v63 }
  0x1c   :  { %vm1080_vm4 = vcmp.eq.s32.totalorder %v1079_v56, 1  ;;  %vm1098_vm5 = vcmp.eq.s32.totalorder %v2392_v52, %v1096_v1 }
  0x1d   :  { %v1767_v4 = vsel %vm1098_vm5, 1.0, %v2176_v6 }
  0x1e   :  { %1867 = vmatmul.mubr.f32.vlgmr.msra.gmra.mrb[0].mxu0 %v112_v12  ;;  %v2321_v12 = vpack.c.bf16 %v531_v28, %v528_v27  ;;  %v1762_v27 = vld [vmem:[%s2472_s2] ss:$0 sm:$0xff] }
  0x1f   :  { %2015 = vmatpush3.bf16.msra.mxu0 %v2005_v8  ;;  %1873 = vmatprep.mubr.msk.f32.mxu0 %vm2175_vm0, %v2176_v6 }
  0x20   :  { %2016 = vmatprep.subr.bf16.mxu0 %v2174_v3 }
  0x26   :  { %1874 = vmatmul.mubr.f32.vlgmr.msra.gmra.mrb[0].mxu0 %v113_v15  ;;  %v2044_v15 = vpack.c.bf16 %v664_v14, %v657_v13 }
  0x27   :  { %2018 = vmatpush3.bf16.msra.mxu0 %v2017_v24  ;;  %1880 = vmatprep.mubr.msk.f32.mxu0 %vm2175_vm0, %v2176_v6  ;;  %v2074_v24 = vpack.c.bf16 %v634_v46, %v627_v45 }
  0x28   :  { %2019 = vmatprep.subr.bf16.mxu0 %v2174_v3 }
  0x2e   :  { %1881 = vmatmul.mubr.f32.vlgmr.msra.gmra.mrb[0].mxu0 %v111_v11 }
  0x2f   :  { %2021 = vmatpush3.bf16.msra.mxu0 %v2005_v8  ;;  %1887 = vmatprep.mubr.msk.f32.mxu0 %vm2175_vm0, %v2176_v6  ;;  %v650_v8 = vand.u32 4294901760, %v649_v2  ;;  %v1092_v2 = vrot.slane %v1084_v0, %v1078_v53 }
  0x30   :  { %2022 = vmatprep.subr.bf16.mxu0 %v2174_v3 }
  0x31   :  { %vm1097_vm6 = vcmp.eq.s32.totalorder %v2392_v52, %v1092_v2 }
  0x36   :  { %1888 = vmatmul.mubr.f32.vlgmr.msra.gmra.mrb[0].mxu0 %v111_v11  ;;  %v2041_v11 = vpack.c.bf16 %v650_v8, %v643_v7  ;;  %v1218_v7 = vsub.f32 %v1767_v4, %v1767_v4  ;;  %v2179_v4 = vmov 1966171168  }
  0x37   :  { %1906 = vmatprep.mubr.msk.f32.mxu0 %vm2175_vm0, %v2176_v6  ;;  %2024 = vmatpush3.bf16.msra.mxu0 %v2321_v12 }
  0x38   :  { %2042 = vmatpush3.bf16.msra.mxu1 %v2041_v11  ;;  %2025 = vmatprep.subr.bf16.mxu0 %v2174_v3  ;;  %v1219_v8 = vand.u32 4294901760, %v1218_v7  ;;  %v1766_v11 = vsel %vm1097_vm6, 1.0, %v2176_v6 }
  0x39   :  { %2043 = vmatprep.subr.bf16.mxu1 %v2174_v3 }
  0x3a   :  { %v1220_v9 = vsub.f32 %v1218_v7, %v1219_v8 }
  0x3b   :  { %2027 = vmatpush3.bf16.msra.mxu0 %v2326_v16 }
  0x3c   :  { %2045 = vmatpush3.bf16.msra.mxu1 %v2044_v15  ;;  %2028 = vmatprep.subr.bf16.mxu0 %v2174_v3  ;;  %v1221_v10 = vand.u32 4294901760, %v1220_v9 }
  0x3d   :  { %2046 = vmatprep.subr.bf16.mxu1 %v2174_v3 }
  0x3f   :  { %2030 = vmatpush3.bf16.msra.mxu0 %v2333_v18 }
  0x40   :  { %2031 = vmatprep.subr.bf16.mxu0 %v2174_v3 }
  0x43   :  { %2033 = vmatpush3.bf16.msra.mxu0 %v2339_v20 }
  0x44   :  { %1768 = vmatprep.subr.msk.mxu0 %vm1098_vm5, %v2178_v5 }
 0x109   :  { %v499_v28 = vpop.f32.mrb[0].mxu0 }
 0x10a   :  { %v2094_v31 = vadd.f32 %v1762_v27, %v499_v28  ;;  %v1889_v32 = vpop.f32.mrb[1].mxu0 }
 0x10c   :  { %v1763_v35 = vmul.f32 -1.442695, %v2094_v31 }
 0x10e   :  { %2132 = vpow2.f32 %v1763_v35 }
 0x118   :  { %v2133_v36 = vpop.eup %2132 }
 0x119   :  { %v506_v37 = vadd.f32 1.0, %v2133_v36 }
 0x11b   :  { %2134 = vrcp.f32 %v506_v37 }
 0x125   :  { %v2135_v38 = vpop.eup %2134 }
 0x126   :  { %v509_v29 = vmul.f32 %v2135_v38, %v2094_v31 }
 0x128   :  { %v525_v30 = vsel %vm523_vm2, %v509_v29, 0 }
 0x129   :  { %v600_v33 = vand.u32 4294901760, %v525_v30 }
 0x12b   :  { %v601_v34 = vsub.f32 %v525_v30, %v600_v33  ;;  %1926 = vmatmul.mubr.f32.vlgmr.msra.gmra.mrb[0].mxu1 %v600_v33 }
 0x12c   :  { %2048 = vmatpush3.bf16.msra.mxu1 %v2047_v17  ;;  %1944 = vmatprep.mubr.msk.f32.mxu1 %vm2175_vm0, %v2176_v6 }
 0x12d   :  { %2049 = vmatprep.subr.bf16.mxu1 %v2174_v3  ;;  %v602_v39 = vand.u32 4294901760, %v601_v34 }
 0x12f   :  { %v603_v40 = vsub.f32 %v601_v34, %v602_v39 }
 0x130   :  { %2051 = vmatpush3.bf16.msra.mxu1 %v2050_v19 }
 0x131   :  { %2052 = vmatprep.subr.bf16.mxu1 %v2174_v3  ;;  %v604_v41 = vand.u32 4294901760, %v603_v40 }
 0x133   :  { %1907 = vmatmul.mubr.f32.vlgmr.msra.gmra.mrb[2].mxu0 %v604_v41 }
 0x134   :  { %2054 = vmatpush3.bf16.msra.mxu1 %v2053_v21  ;;  %1205 = vmatprep.mubr.f32.mxu0 %v2176_v6 }
 0x135   :  { %2055 = vmatprep.subr.bf16.mxu1 %v2174_v3  ;;  %1769 = vmatpush1.msk.msra.mxu0 %vm1097_vm6, %v2178_v5 }
 0x136   :  { %1222 = vmatprep.subr.mxu0 %v1221_v10 }
 0x138   :  { %2057 = vmatpush3.bf16.msra.mxu1 %v2056_v22 }
 0x139   :  { %2058 = vmatprep.subr.bf16.mxu1 %v2174_v3 }
 0x13b   :  { %1945 = vmatmul.mubr.f32.vlgmr.msra.gmra.mrb[0].mxu1 %v601_v34 }
 0x13c   :  { %2060 = vmatpush3.bf16.msra.mxu1 %v2321_v12  ;;  %1963 = vmatprep.mubr.msk.f32.mxu1 %vm2175_vm0, %v2176_v6 }
 0x13d   :  { %2061 = vmatprep.subr.bf16.mxu1 %v2174_v3 }
 0x140   :  { %2063 = vmatpush3.bf16.msra.mxu1 %v2326_v16 }
 0x141   :  { %2064 = vmatprep.subr.bf16.mxu1 %v2174_v3 }
 0x144   :  { %2066 = vmatpush3.bf16.msra.mxu1 %v2333_v18 }
 0x145   :  { %2067 = vmatprep.subr.bf16.mxu1 %v2174_v3 }
 0x148   :  { %2069 = vmatpush3.bf16.msra.mxu1 %v2339_v20 }
 0x149   :  { %2070 = vmatprep.subr.bf16.mxu1 %v2174_v3 }
 0x14b   :  { %1964 = vmatmul.mubr.f32.vlgmr.msra.gmra.mrb[0].mxu1 %v602_v39 }
 0x14c   :  { %2072 = vmatpush3.bf16.msra.mxu1 %v2071_v23  ;;  %1982 = vmatprep.mubr.msk.f32.mxu1 %vm2175_vm0, %v2176_v6  ;;  %v2433_v23 = vld [vmem:[%s2477_s7] sm:$0x7f] }
 0x14d   :  { %2073 = vmatprep.subr.bf16.mxu1 %v2174_v3 }
 0x150   :  { %2075 = vmatpush3.bf16.msra.mxu1 %v2074_v24  ;;  %v2438_v24 = vld [vmem:[%s2477_s7 + $0x8] sm:$0x7f]  ;;  %s2180_s7 = smov [#allocation2]  }
 0x151   :  { %2076 = vmatprep.subr.bf16.mxu1 %v2174_v3  ;;  %s1754_s12 = sshll.u32 %s2180_s7, 4  ;;  %s1755_s12 = int_to_ptr.vmem [resolvable:$true] %s1754_s12 }
 0x152   :  { %s2150_s13 = scalar_lea.vmem %s1755_s12, 128  ;;  %p2155_p1 = scmp.lt.s32.totalorder %s1755_s12, %s1755_s12 }
 0x153   :  { %p2151_p0 = scmp.ne.s32.totalorder %s1755_s12, %s2150_s13  ;;  %p2156_p2 = scmp.lt.s32.totalorder %s2150_s13, %s2150_s13 }
 0x154   :  { %2078 = vmatpush3.bf16.msra.mxu1 %v2077_v25 }
 0x155   :  { %2079 = vmatprep.subr.bf16.mxu1 %v2174_v3  ;;  %p2157_p3 = por %p2156_p2, %p2155_p1 }
 0x157   :  { %p2158_p4 = pnand %p2157_p3, %p2151_p0 }
 0x158   :  { %2081 = vmatpush3.bf16.msra.mxu1 %v2080_v26 }
 0x159   :  { %2082 = vmatprep.subr.bf16.mxu1 %v2174_v3 }
 0x15b   :  { %1983 = vmatmul.mubr.f32.vlgmr.msra.gmra.mrb[0].mxu1 %v600_v33 }
 0x15c   :  { %2084 = vmatpush3.bf16.msra.mxu1 %v2321_v12  ;;  %2001 = vmatprep.mubr.msk.f32.mxu1 %vm2175_vm0, %v2176_v6  ;;  %v1224_v12 = vsub.f32 %v1766_v11, %v1766_v11 }
 0x15d   :  { %2085 = vmatprep.subr.bf16.mxu1 %v2174_v3 }
 0x15e   :  { %v1225_v15 = vand.u32 4294901760, %v1224_v12 }
 0x160   :  { %2087 = vmatpush3.bf16.msra.mxu1 %v2326_v16 }
 0x161   :  { %2088 = vmatprep.subr.bf16.mxu1 %v2174_v3 }
 0x164   :  { %2090 = vmatpush3.bf16.msra.mxu1 %v2333_v18  ;;  %v1226_v18 = vsub.f32 %v1224_v12, %v1225_v15 }
 0x165   :  { %2091 = vmatprep.subr.bf16.mxu1 %v2174_v3 }
 0x166   :  { %v1227_v21 = vand.u32 4294901760, %v1226_v18 }
 0x168   :  { %2093 = vmatpush3.bf16.msra.mxu1 %v2339_v20 }
 0x16b   :  { %2002 = vmatmul.mubr.f32.vlgmr.msra.gmra.mrb[0].mxu1 %v600_v33 }
 0x206   :  { %v606_v42 = vpop.f32.mrb[2].mxu0 }
 0x207   :  { %v1908_v43 = vpop.f32.mrb[3].mxu0  ;;  %v607_v45 = vadd.f32 %v1764_v44, %v606_v42 }
 0x23e   :  { %v1060_v46 = vpop.f32.mrb[0].mxu1 }
 0x23f   :  { %v2096_v47 = vadd.f32 %v1060_v46, %v607_v45  ;;  %v2003_v48 = vpop.f32.mrb[1].mxu1 }
 0x241   :  { %v1067_v50 = vadd.f32 0.5, %v2096_v47 }
 0x243   :  { %v1068_v3 = vmul.f32 1.442695, %v1067_v50 }
 0x245   :  { %2136 = vpow2.f32 %v1068_v3 }
 0x24f   :  { %v2137_v58 = vpop.eup %2136 }
 0x250   :  { %v1074_v59 = vmul.f32 %v2137_v58, %v1765_v57 }
 0x252   :  { %v1081_v61 = vsel %vm1080_vm4, %v1074_v59, %v2096_v47 }
 0x253   :  { %v1083_v62 = vadd.f32 %v1082_v60, %v1081_v61 }
 0x255   :  { %1103 = vxpose.xlu0.b32.start.end [1/1] (short) (narrow) %v1083_v62, 8 }
 0x2d5   :  { %v1119_v13 = vpop.trf.xlu0 }
 0x2d6   :  { %v1137_v14 = vsel %vm1135_vm7, %v1119_v13, 0 }
 0x2d7   :  { %v1206_v16 = vand.u32 4294901760, %v1137_v14 }
 0x2d9   :  { %v1207_v17 = vsub.f32 %v1137_v14, %v1206_v16 }
 0x2db   :  { %v1208_v19 = vand.u32 4294901760, %v1207_v17 }
 0x2dd   :  { %v1209_v20 = vsub.f32 %v1207_v17, %v1208_v19 }
 0x2df   :  { %v1210_v22 = vand.u32 4294901760, %v1209_v20 }
 0x2e1   :  { %1211 = vmatmul.mubr.f32.vlgmr.msra.gmra.mrb[4].mxu0 %v1210_v22 }
 0x2e2   :  { %1228 = vmatpush1.msra.mxu0 %v1227_v21  ;;  %1291 = vmatprep.mubr.f32.mxu0 %v2176_v6 }
 0x2e3   :  { %1301 = vmatprep.subr.mxu0 %v1218_v7 }
 0x2e9   :  { %1293 = vmatmul.mubr.f32.vlgmr.msra.gmra.mrb[4].mxu0 %v1206_v16 }
 0x2ea   :  { %1304 = vmatpush1.msra.mxu0 %v1224_v12  ;;  %1367 = vmatprep.mubr.f32.mxu0 %v2176_v6 }
 0x2eb   :  { %1770 = vmatprep.subr.msk.mxu0 %vm1098_vm5, %v2178_v5 }
 0x2f1   :  { %1370 = vmatmul.mubr.f32.vlgmr.msra.gmra.mrb[4].mxu0 %v1207_v17 }
 0x2f2   :  { %1771 = vmatpush1.msk.msra.mxu0 %vm1097_vm6, %v2178_v5  ;;  %1442 = vmatprep.mubr.f32.mxu0 %v2176_v6 }
 0x2f3   :  { %1455 = vmatprep.subr.mxu0 %v1219_v8 }
 0x2f9   :  { %1446 = vmatmul.mubr.f32.vlgmr.msra.gmra.mrb[4].mxu0 %v1208_v19 }
 0x2fa   :  { %1459 = vmatpush1.msra.mxu0 %v1225_v15  ;;  %1522 = vmatprep.mubr.f32.mxu0 %v2176_v6 }
 0x2fb   :  { %1772 = vmatprep.subr.msk.mxu0 %vm1098_vm5, %v2178_v5 }
 0x301   :  { %1524 = vmatmul.mubr.f32.vlgmr.msra.gmra.mrb[4].mxu0 %v1206_v16 }
 0x302   :  { %1773 = vmatpush1.msk.msra.mxu0 %vm1097_vm6, %v2178_v5  ;;  %1596 = vmatprep.mubr.f32.mxu0 %v2176_v6  ;;  %v1686_v5 = vunpack.c.l.s4 %v2179_v4 }
 0x304   :  { %v1687_v7 = vunpack.c.0.s8 %v1686_v5 }
 0x306   :  { %v1690_v13 = vsub.s32 %v1687_v7, %v2392_v52 }
 0x309   :  { %1598 = vmatmul.mubr.f32.vlgmr.msra.gmra.mrb[4].mxu0 %v1206_v16 }
 0x3dc   :  { %v1599_v25 = vpop.f32.mrb[4].mxu0 }
 0x3dd   :  { %v1604_v26 = vmul.f32 %v1599_v25, %v2433_v23  ;;  %v1601_v27 = vpop.f32.mrb[5].mxu0 }
 0x3de   :  { %v1605_v28 = vmul.f32 %v1601_v27, %v2438_v24 }
 0x3df   :  { %v1607_v6 = vsel %vm1606_vm8, %v1604_v26, 0.0  ;;  %v1631_v31 = vrot.slane %v1604_v26, 3 }
 0x3e0   :  { %v1608_v32 = vrot.slane %v1607_v6, 4  ;;  %v1614_v35 = vsel %vm1606_vm8, %v1605_v28, 0.0  ;;  %v1632_v36 = vrot.slane %v1605_v28, 3 }
 0x3e1   :  { %v1636_v37 = vsel %vm1635_vm9, %v1631_v31, 0.0  ;;  %v1615_v38 = vrot.slane %v1614_v35, 4 }
 0x3e2   :  { %v1609_v29 = vadd.f32 %v1608_v32, %v1607_v6  ;;  %v1637_v30 = vrot.slane %v1636_v37, 4  ;;  %v1643_v33 = vsel %vm1635_vm9, %v1632_v36, 0.0 }
 0x3e3   :  { %v1616_v34 = vadd.f32 %v1615_v38, %v1614_v35  ;;  %v1644_v39 = vrot.slane %v1643_v33, 4 }
 0x3e4   :  { %v1610_v40 = vrot.slane %v1609_v29, 2  ;;  %v1638_v41 = vadd.f32 %v1637_v30, %v1636_v37 }
 0x3e5   :  { %v1617_v42 = vrot.slane %v1616_v34, 2  ;;  %v1645_v43 = vadd.f32 %v1644_v39, %v1643_v33 }
 0x3e6   :  { %v1611_v44 = vadd.f32 %v1610_v40, %v1609_v29  ;;  %v1639_v45 = vrot.slane %v1638_v41, 2 }
 0x3e7   :  { %v1618_v46 = vadd.f32 %v1617_v42, %v1616_v34  ;;  %v1646_v47 = vrot.slane %v1645_v43, 2 }
 0x3e8   :  { %v1612_v48 = vrot.slane %v1611_v44, 1  ;;  %v1640_v50 = vadd.f32 %v1639_v45, %v1638_v41 }
 0x3e9   :  { %v1619_v51 = vrot.slane %v1618_v46, 1  ;;  %v1647_v3 = vadd.f32 %v1646_v47, %v1645_v43 }
 0x3ea   :  { %v1613_v53 = vadd.f32 %v1612_v48, %v1611_v44  ;;  %v1641_v54 = vrot.slane %v1640_v50, 1 }
 0x3eb   :  { %v1620_v55 = vadd.f32 %v1619_v51, %v1618_v46  ;;  %v1648_v56 = vrot.slane %v1647_v3, 1 }
 0x3ec   :  { %v1621_v57 = vadd.f32 %v1613_v53, %v1599_v25  ;;  %v1642_v58 = vadd.f32 %v1641_v54, %v1640_v50 }
 0x3ed   :  { %v1622_v59 = vadd.f32 %v1620_v55, %v1601_v27  ;;  %v1649_v60 = vadd.f32 %v1648_v56, %v1647_v3 }
 0x3ee   :  { %v1623_v61 = vmul.f32 1.442695, %v1621_v57  ;;  %v1650_v62 = vadd.f32 %v1642_v58, %v1599_v25 }
 0x3ef   :  { %v1625_v63 = vmul.f32 1.442695, %v1622_v59  ;;  %v1651_v0 = vadd.f32 %v1649_v60, %v1601_v27 }
 0x3f0   :  { %2138 = vpow2.f32 %v1623_v61  ;;  %v1774_v1 = vmul.f32 -1.442695, %v1650_v62 }
 0x3f1   :  { %2140 = vpow2.f32 %v1625_v63  ;;  %v1775_v2 = vmul.f32 -1.442695, %v1651_v0 }
 0x3f2   :  { %2142 = vpow2.f32 %v1774_v1 }
 0x3f3   :  { %2144 = vpow2.f32 %v1775_v2 }
 0x3fa   :  { %v2139_v8 = vpop.eup %2138 }
 0x3fb   :  { %v2141_v9 = vpop.eup %2140  ;;  %v1627_v10 = vmin.f32 %v2139_v8, 1000000.0 }
 0x3fc   :  { %v2143_v11 = vpop.eup %2142  ;;  %v1628_v12 = vmin.f32 %v2141_v9, 1000000.0 }
 0x3fd   :  { %v2145_v14 = vpop.eup %2144  ;;  %v1658_v15 = vadd.f32 1.0, %v2143_v11  ;;  %v1668_v37 = vmul.f32 %v1627_v10, %v2433_v23 }
 0x3fe   :  { %v1659_v16 = vadd.f32 1.0, %v2145_v14  ;;  %v1708_v17 = vcombine.high %v1627_v10, %v1628_v12  ;;  %v1669_v29 = vmul.f32 %v1628_v12, %v2438_v24 }
 0x3ff   :  { %2146 = vrcp.f32 %v1658_v15 }
 0x400   :  { %2148 = vrcp.f32 %v1659_v16  ;;  %v1715_v18 = vrot.slane %v1708_v17, %v1690_v13 }
 0x402   :  { %v1716_v19 = vcombine.high %v1715_v18, %v1715_v18 }
 0x404   :  { %v1723_v21 = vrot.slane %v1716_v19, %v1690_v13 }
 0x406   :  { %1726 = vst.msk [vmem:[#allocation2 + $0x1] ss:$4 sm:$0x3] %vm2444_vm10, %v1723_v21 }
 0x409   :  { %v2147_v22 = vpop.eup %2146 }
 0x40a   :  { %v2149_v25 = vpop.eup %2148  ;;  %v1664_v52 = vmax.f32 %v2147_v22, 1e-06 }
 0x40b   :  { %v1665_v26 = vmax.f32 %v2149_v25, 1e-06 }
 0x40c   :  { %v1666_v27 = vmin.f32 %v1664_v52, 0.999999 }
 0x40d   :  { %v1667_v28 = vmin.f32 %v1665_v26, 0.999999 }
 0x40e   :  { %v1670_v6 = vmul.f32 %v1666_v27, %v2433_v23 }
 0x40f   :  { %v1671_v31 = vmul.f32 %v1667_v28, %v2438_v24  ;;  %v1684_v32 = vcombine.high %v1666_v27, %v1667_v28 }
 0x410   :  { %v1672_v35 = vsub.f32 1.0, %v1670_v6 }
 0x411   :  { %v1673_v49 = vsub.f32 1.0, %v1671_v31  ;;  %v1691_v36 = vrot.slane %v1684_v32, %v1690_v13 }
 0x412   :  { %v1676_v38 = vrot.slane %v1672_v35, 1 }
 0x413   :  { %v1677_v30 = vrot.slane %v1673_v49, 1  ;;  %v1698_v33 = vrot.slane %v1691_v36, %v1690_v13 }
 0x414   :  { %v1680_v34 = vmul.f32 %v1676_v38, %v1668_v37 }
 0x415   :  { %v1681_v39 = vmul.f32 %v1677_v30, %v1669_v29  ;;  %v1699_v40 = vcombine.high %v1698_v33, %v1698_v33 }
 0x417   :  { %v1729_v41 = vcombine.high %v1680_v34, %v1681_v39  ;;  %1705 = vst.msk [vmem:[#allocation2] ss:$4 sm:$0x3] %vm2444_vm10, %v1699_v40 }
 0x419   :  { %v1736_v42 = vrot.slane %v1729_v41, %v1690_v13 }
 0x41b   :  { %v1737_v43 = vcombine.high %v1736_v42, %v1736_v42 }
 0x41d   :  { %v1744_v44 = vrot.slane %v1737_v43, %v1690_v13 }
 0x41f   :  { %1747 = vst.msk [vmem:[#allocation2 + $0x2] ss:$4 sm:$0x3] %vm2444_vm10, %v1744_v44 }
 0x420   :  { %2161 = shalt.err (!%p2158_p4)
}
 0x421   :  { %s2162_s16 = scalar_lea.hbm %s2478_s8, 128 }
 0x422   :  { %p2163_p5 = scmp.ne.s32.totalorder %s2478_s8, %s2162_s16  ;;  %p2166_p6 = scmp.lt.u32.totalorder %s2162_s16, %s2478_s8 }
 0x424   :  { %p2168_p7 = pnand %p2166_p6, %p2163_p5 }
 0x426   :  { %2171 = shalt.err (!%p2168_p7)
}
 0x427   :  { %1757 = dma.vmem_to_hbm [thread:$0]  %s1755_s12, 128, %s2478_s8, [#allocation3]  }
 0x428   :  { %2172 = dma.done.wait [#allocation3], 128  }
 0x429   :  { %2173 = vsyncadd [#allocation3], 4294967168 }
 0x42a   :  { %1761 = vsyncpa [#allocation3], 1 }

</bundles_post_ra>
